<compile_context>
chip_gen: v6e
topology: v6e:2x2x1
jax: 0.10.0
libtpu: 0.0.40
codegen_flags: <defaults>
</compile_context>

<pallas_src>
import jax
import jax.numpy as jnp
from jax.experimental import pallas as pl
from jax.experimental.pallas import tpu as pltpu

_OUT_LANES = 128  # lane-dense output width (unmasked stores)


def _round_up(x, m):
    return (x + m - 1) // m * m


def _make_dmf_kernel(layer, tb, m, n):
    """Kernel closed over static layer count, batch tile and table row counts."""

    def kernel(uidx_ref, iidx_ref,             # SMEM scalar prefetch, (Bp,) i32
               u_tab_ref, u_wh_ref, u_b_ref,   # (m,h), (layer,h,h), (layer+1,1,h)
               i_tab_ref, i_wh_ref, i_b_ref,   # (n,h), (layer,h,h), (layer+1,1,h)
               out_ref):                       # (tb, _OUT_LANES)
        base = pl.program_id(0) * tb

        def gather(idx_ref, tab_ref, num_rows):
            # Unrolled dynamic row reads of the (already embedding-folded)
            # first-layer table; indices come from SMEM.
            rows = []
            for r in range(tb):
                rid = idx_ref[base + r]
                # Clamp to a valid row instead of reading OOB VMEM.
                # (PyTorch nn.Embedding would raise on out-of-range indices.)
                rid = jnp.clip(rid, 0, num_rows - 1)
                rows.append(tab_ref[pl.ds(rid, 1), :])
            return jnp.concatenate(rows, axis=0)          # (tb, h) f32

        def mlp(x0, wh_ref, b_ref):
            # Matches the PyTorch Sequential: [Linear] + layer*[Linear, ReLU].
            # The embedding @ W0 product is pre-folded into the table, so the
            # first Linear is just "+ bias" here (no activation, as in torch).
            x = x0 + b_ref[0]
            for l in range(layer):
                x = jnp.dot(x, wh_ref[l],
                            preferred_element_type=jnp.float32) + b_ref[l + 1]
                x = jnp.maximum(x, jnp.float32(0.0))
            return x

        u = mlp(gather(uidx_ref, u_tab_ref, m), u_wh_ref, u_b_ref)   # (tb, h)
        v = mlp(gather(iidx_ref, i_tab_ref, n), i_wh_ref, i_b_ref)   # (tb, h)

        # cosine_similarity(u, v, dim=1, eps=1e-8):
        #   dot / max(||u||*||v||, eps) == dot * rsqrt(max(||u||^2*||v||^2, eps^2))
        # (fused: a single EUP rsqrt instead of two sqrt + one divide).
        dot = jnp.sum(u * v, axis=1, keepdims=True)
        nu2 = jnp.sum(u * u, axis=1, keepdims=True)
        nv2 = jnp.sum(v * v, axis=1, keepdims=True)
        eps = jnp.float32(1e-8)
        cos = dot * jax.lax.rsqrt(jnp.maximum(nu2 * nv2, eps * eps))

        # out = where(out < 1e-6, 1e-6, out); broadcast lane-dense so the final
        # store is an unmasked full-vreg vst; the wrapper slices column 0.
        clamped = jnp.where(cos < jnp.float32(1e-6), jnp.float32(1e-6), cos)
        out_ref[...] = jnp.broadcast_to(clamped, (tb, _OUT_LANES))

    return kernel


def fold_params(embedding, user_params, item_params):
    """One-time setup: fold the frozen embedding into the first Linear and
    pack the remaining per-layer params into stacked tensors."""
    assert len(user_params) >= 2 and len(item_params) >= 2, "need layer >= 1"
    (u_w0, u_b0), u_rest = user_params[0], user_params[1:]
    (i_w0, i_b0), i_rest = item_params[0], item_params[1:]
    u_tab = embedding @ u_w0            # (m, h): row uid == embedding[uid] @ Wu0
    i_tab = embedding.T @ i_w0          # (n, h): row iid == embedding.T[iid] @ Wi0
    u_wh = jnp.stack([w for w, _ in u_rest])               # (layer, h, h)
    i_wh = jnp.stack([w for w, _ in i_rest])               # (layer, h, h)
    u_b = jnp.stack([u_b0] + [b for _, b in u_rest])       # (layer+1, 1, h)
    i_b = jnp.stack([i_b0] + [b for _, b in i_rest])       # (layer+1, 1, h)
    return u_tab, u_wh, u_b, i_tab, i_wh, i_b


def dmf_forward(user_idx, item_idx, folded):
    """DMF forward using the folded/packed parameter bundle."""
    u_tab, u_wh, u_b, i_tab, i_wh, i_b = folded
    m, _ = u_tab.shape
    n = i_tab.shape[0]
    layer = u_wh.shape[0]
    batch = user_idx.shape[0]

    # Batch tile: multiple of 8 sublanes (f32), capped at 128; pad batch up.
    tb = min(128, _round_up(batch, 8))
    bp = _round_up(batch, tb)
    uid = jnp.zeros((bp,), jnp.int32).at[:batch].set(user_idx.astype(jnp.int32))
    iid = jnp.zeros((bp,), jnp.int32).at[:batch].set(item_idx.astype(jnp.int32))

    kernel = _make_dmf_kernel(layer, tb, m, n)

    out = pl.pallas_call(
        kernel,
        out_shape=jax.ShapeDtypeStruct((bp, _OUT_LANES), jnp.float32),
        grid_spec=pltpu.PrefetchScalarGridSpec(
            num_scalar_prefetch=2,                 # uid, iid -> SMEM
            grid=(bp // tb,),
            in_specs=[
                pl.BlockSpec(u_tab.shape, lambda b, u, i: (0, 0)),
                pl.BlockSpec(u_wh.shape, lambda b, u, i: (0, 0, 0)),
                pl.BlockSpec(u_b.shape, lambda b, u, i: (0, 0, 0)),
                pl.BlockSpec(i_tab.shape, lambda b, u, i: (0, 0)),
                pl.BlockSpec(i_wh.shape, lambda b, u, i: (0, 0, 0)),
                pl.BlockSpec(i_b.shape, lambda b, u, i: (0, 0, 0)),
            ],
            out_specs=pl.BlockSpec((tb, _OUT_LANES), lambda b, u, i: (b, 0)),
        ),
        compiler_params=pltpu.CompilerParams(
            dimension_semantics=("parallel",)),    # batch blocks shard on v7x
    )(uid, iid, u_tab, u_wh, u_b, i_tab, i_wh, i_b)
    return out[:batch, 0]


def _init_linear(key, in_f, out_f):
    """PyTorch-style nn.Linear init, but weight stored as (in_f, out_f)."""
    kw, kb = jax.random.split(key)
    bound = 1.0 / jnp.sqrt(jnp.float32(in_f))
    w = jax.random.uniform(kw, (in_f, out_f), jnp.float32, -bound, bound)
    b = jax.random.uniform(kb, (1, out_f), jnp.float32, -bound, bound)
    return w, b


def build_params(key, m, n, hidden_dim, layer):
    keys = jax.random.split(key, 2 * (layer + 1))
    k_iter = iter(keys)
    user_params = [_init_linear(next(k_iter), n, hidden_dim)]
    for _ in range(layer):
        user_params.append(_init_linear(next(k_iter), hidden_dim, hidden_dim))
    item_params = [_init_linear(next(k_iter), m, hidden_dim)]
    for _ in range(layer):
        item_params.append(_init_linear(next(k_iter), hidden_dim, hidden_dim))
    return user_params, item_params


if __name__ == "__main__":
    # Small, forward-consistent shapes:
    m, n = 16, 32            # rating matrix: m users x n items
    hidden_dim = 32
    layer = 2
    batch = 8

    root = jax.random.PRNGKey(0)
    k_emb, k_par, k_u, k_i = jax.random.split(root, 4)

    # Pretrained "embedding" = rating matrix (m, n), deterministic.
    embedding = jax.random.uniform(k_emb, (m, n), jnp.float32, 0.0, 5.0)
    user_params, item_params = build_params(k_par, m, n, hidden_dim, layer)

    # One-time setup: fold the frozen embedding into the first Linear layers
    # and pack the remaining params into stacked tensors.
    folded = fold_params(embedding, user_params, item_params)

    user_idx = jax.random.randint(k_u, (batch,), 0, m)
    item_idx = jax.random.randint(k_i, (batch,), 0, n)

    out = dmf_forward(user_idx, item_idx, folded)
    out = jax.block_until_ready(out)

    # Pure-JAX reference check (un-folded math, no Pallas).
    def ref_mlp(x, params):
        w, b = params[0]
        x = x @ w + b
        for w, b in params[1:]:
            x = jnp.maximum(x @ w + b, 0.0)
        return x

    u_ref = ref_mlp(embedding[user_idx], user_params)
    v_ref = ref_mlp(embedding.T[item_idx], item_params)
    dot = jnp.sum(u_ref * v_ref, axis=1)
    den = jnp.maximum(jnp.linalg.norm(u_ref, axis=1)
                      * jnp.linalg.norm(v_ref, axis=1), 1e-8)
    cos = dot / den
    ref = jnp.where(cos < 1e-6, 1e-6, cos)

    assert out.shape == (batch,)
    assert jnp.allclose(out, ref, atol=1e-4, rtol=1e-4), (out, ref)
    print("KERNEL_OK")
</pallas_src>

<mosaic_0001>
module attributes {stable_mosaic.version = 11 : i64} {
  func.func @kernel(%arg0: i32, %arg1: memref<8xi32, #tpu.memory_space<smem>>, %arg2: memref<8xi32, #tpu.memory_space<smem>>, %arg3: memref<16x32xf32, #tpu.memory_space<vmem>>, %arg4: memref<2x32x32xf32, #tpu.memory_space<vmem>>, %arg5: memref<3x1x32xf32, #tpu.memory_space<vmem>>, %arg6: memref<32x32xf32, #tpu.memory_space<vmem>>, %arg7: memref<2x32x32xf32, #tpu.memory_space<vmem>>, %arg8: memref<3x1x32xf32, #tpu.memory_space<vmem>>, %arg9: memref<8x128xf32, #tpu.memory_space<vmem>>) attributes {dimension_semantics = [#tpu.dimension_semantics<parallel>], iteration_bounds = array<i64: 1>, scalar_prefetch = 2 : i64, scratch_operands = 0 : i64, tpu.core_type = #tpu.core_type<tc>, window_params = [{pipeline_mode = #tpu.pipeline_mode<synchronous>, transform_indices = @transform_0, window_bounds = array<i64: 16, 32>}, {pipeline_mode = #tpu.pipeline_mode<synchronous>, transform_indices = @transform_1, window_bounds = array<i64: 2, 32, 32>}, {pipeline_mode = #tpu.pipeline_mode<synchronous>, transform_indices = @transform_2, window_bounds = array<i64: 3, 1, 32>}, {pipeline_mode = #tpu.pipeline_mode<synchronous>, transform_indices = @transform_3, window_bounds = array<i64: 32, 32>}, {pipeline_mode = #tpu.pipeline_mode<synchronous>, transform_indices = @transform_4, window_bounds = array<i64: 2, 32, 32>}, {pipeline_mode = #tpu.pipeline_mode<synchronous>, transform_indices = @transform_5, window_bounds = array<i64: 3, 1, 32>}, {transform_indices = @transform_6, window_bounds = array<i64: 8, 128>}]} {
    %c8_i32 = arith.constant 8 : i32
    %0 = arith.muli %arg0, %c8_i32 : i32
    %c0_i32 = arith.constant 0 : i32
    %1 = arith.addi %0, %c0_i32 : i32
    %2 = arith.index_cast %1 : i32 to index
    %3 = memref.load %arg1[%2] : memref<8xi32, #tpu.memory_space<smem>>
    %c0_i32_0 = arith.constant 0 : i32
    %c15_i32 = arith.constant 15 : i32
    %4 = arith.maxsi %c0_i32_0, %3 : i32
    %5 = arith.minsi %c15_i32, %4 : i32
    %6 = arith.index_cast %5 : i32 to index
    %c0 = arith.constant 0 : index
    %7 = vector.load %arg3[%6, %c0] : memref<16x32xf32, #tpu.memory_space<vmem>>, vector<1x32xf32>
    %c1_i32 = arith.constant 1 : i32
    %8 = arith.addi %0, %c1_i32 : i32
    %9 = arith.index_cast %8 : i32 to index
    %10 = memref.load %arg1[%9] : memref<8xi32, #tpu.memory_space<smem>>
    %c0_i32_1 = arith.constant 0 : i32
    %c15_i32_2 = arith.constant 15 : i32
    %11 = arith.maxsi %c0_i32_1, %10 : i32
    %12 = arith.minsi %c15_i32_2, %11 : i32
    %13 = arith.index_cast %12 : i32 to index
    %c0_3 = arith.constant 0 : index
    %14 = vector.load %arg3[%13, %c0_3] : memref<16x32xf32, #tpu.memory_space<vmem>>, vector<1x32xf32>
    %c2_i32 = arith.constant 2 : i32
    %15 = arith.addi %0, %c2_i32 : i32
    %16 = arith.index_cast %15 : i32 to index
    %17 = memref.load %arg1[%16] : memref<8xi32, #tpu.memory_space<smem>>
    %c0_i32_4 = arith.constant 0 : i32
    %c15_i32_5 = arith.constant 15 : i32
    %18 = arith.maxsi %c0_i32_4, %17 : i32
    %19 = arith.minsi %c15_i32_5, %18 : i32
    %20 = arith.index_cast %19 : i32 to index
    %c0_6 = arith.constant 0 : index
    %21 = vector.load %arg3[%20, %c0_6] : memref<16x32xf32, #tpu.memory_space<vmem>>, vector<1x32xf32>
    %c3_i32 = arith.constant 3 : i32
    %22 = arith.addi %0, %c3_i32 : i32
    %23 = arith.index_cast %22 : i32 to index
    %24 = memref.load %arg1[%23] : memref<8xi32, #tpu.memory_space<smem>>
    %c0_i32_7 = arith.constant 0 : i32
    %c15_i32_8 = arith.constant 15 : i32
    %25 = arith.maxsi %c0_i32_7, %24 : i32
    %26 = arith.minsi %c15_i32_8, %25 : i32
    %27 = arith.index_cast %26 : i32 to index
    %c0_9 = arith.constant 0 : index
    %28 = vector.load %arg3[%27, %c0_9] : memref<16x32xf32, #tpu.memory_space<vmem>>, vector<1x32xf32>
    %c4_i32 = arith.constant 4 : i32
    %29 = arith.addi %0, %c4_i32 : i32
    %30 = arith.index_cast %29 : i32 to index
    %31 = memref.load %arg1[%30] : memref<8xi32, #tpu.memory_space<smem>>
    %c0_i32_10 = arith.constant 0 : i32
    %c15_i32_11 = arith.constant 15 : i32
    %32 = arith.maxsi %c0_i32_10, %31 : i32
    %33 = arith.minsi %c15_i32_11, %32 : i32
    %34 = arith.index_cast %33 : i32 to index
    %c0_12 = arith.constant 0 : index
    %35 = vector.load %arg3[%34, %c0_12] : memref<16x32xf32, #tpu.memory_space<vmem>>, vector<1x32xf32>
    %c5_i32 = arith.constant 5 : i32
    %36 = arith.addi %0, %c5_i32 : i32
    %37 = arith.index_cast %36 : i32 to index
    %38 = memref.load %arg1[%37] : memref<8xi32, #tpu.memory_space<smem>>
    %c0_i32_13 = arith.constant 0 : i32
    %c15_i32_14 = arith.constant 15 : i32
    %39 = arith.maxsi %c0_i32_13, %38 : i32
    %40 = arith.minsi %c15_i32_14, %39 : i32
    %41 = arith.index_cast %40 : i32 to index
    %c0_15 = arith.constant 0 : index
    %42 = vector.load %arg3[%41, %c0_15] : memref<16x32xf32, #tpu.memory_space<vmem>>, vector<1x32xf32>
    %c6_i32 = arith.constant 6 : i32
    %43 = arith.addi %0, %c6_i32 : i32
    %44 = arith.index_cast %43 : i32 to index
    %45 = memref.load %arg1[%44] : memref<8xi32, #tpu.memory_space<smem>>
    %c0_i32_16 = arith.constant 0 : i32
    %c15_i32_17 = arith.constant 15 : i32
    %46 = arith.maxsi %c0_i32_16, %45 : i32
    %47 = arith.minsi %c15_i32_17, %46 : i32
    %48 = arith.index_cast %47 : i32 to index
    %c0_18 = arith.constant 0 : index
    %49 = vector.load %arg3[%48, %c0_18] : memref<16x32xf32, #tpu.memory_space<vmem>>, vector<1x32xf32>
    %c7_i32 = arith.constant 7 : i32
    %50 = arith.addi %0, %c7_i32 : i32
    %51 = arith.index_cast %50 : i32 to index
    %52 = memref.load %arg1[%51] : memref<8xi32, #tpu.memory_space<smem>>
    %c0_i32_19 = arith.constant 0 : i32
    %c15_i32_20 = arith.constant 15 : i32
    %53 = arith.maxsi %c0_i32_19, %52 : i32
    %54 = arith.minsi %c15_i32_20, %53 : i32
    %55 = arith.index_cast %54 : i32 to index
    %c0_21 = arith.constant 0 : index
    %56 = vector.load %arg3[%55, %c0_21] : memref<16x32xf32, #tpu.memory_space<vmem>>, vector<1x32xf32>
    %57 = tpu.concatenate %7, %14, %21, %28, %35, %42, %49, %56 in 0 : vector<1x32xf32>, vector<1x32xf32>, vector<1x32xf32>, vector<1x32xf32>, vector<1x32xf32>, vector<1x32xf32>, vector<1x32xf32>, vector<1x32xf32> -> vector<8x32xf32>
    %c0_22 = arith.constant 0 : index
    %c0_23 = arith.constant 0 : index
    %c0_24 = arith.constant 0 : index
    %58 = vector.load %arg5[%c0_22, %c0_23, %c0_24] : memref<3x1x32xf32, #tpu.memory_space<vmem>>, vector<1x1x32xf32>
    %59 = vector.shape_cast %58 : vector<1x1x32xf32> to vector<1x32xf32>
    %60 = vector.broadcast %59 : vector<1x32xf32> to vector<8x32xf32>
    %61 = arith.addf %57, %60 : vector<8x32xf32>
    %c0_25 = arith.constant 0 : index
    %c0_26 = arith.constant 0 : index
    %c0_27 = arith.constant 0 : index
    %62 = vector.load %arg4[%c0_25, %c0_26, %c0_27] : memref<2x32x32xf32, #tpu.memory_space<vmem>>, vector<1x32x32xf32>
    %63 = vector.shape_cast %62 : vector<1x32x32xf32> to vector<32x32xf32>
    %cst = arith.constant dense<0.000000e+00> : vector<8x32xf32>
    %64 = tpu.matmul %61, %63, %cst {dimension_numbers = #tpu.dot_dimension_numbers<[1], [0], [0], [1], [0, 0, 1, 1], [], []>} : vector<8x32xf32>, vector<32x32xf32>, vector<8x32xf32> -> vector<8x32xf32>
    %c1 = arith.constant 1 : index
    %c0_28 = arith.constant 0 : index
    %c0_29 = arith.constant 0 : index
    %65 = vector.load %arg5[%c1, %c0_28, %c0_29] : memref<3x1x32xf32, #tpu.memory_space<vmem>>, vector<1x1x32xf32>
    %66 = vector.shape_cast %65 : vector<1x1x32xf32> to vector<1x32xf32>
    %67 = vector.broadcast %66 : vector<1x32xf32> to vector<8x32xf32>
    %68 = arith.addf %64, %67 : vector<8x32xf32>
    %cst_30 = arith.constant 0.000000e+00 : f32
    %69 = vector.broadcast %cst_30 : f32 to vector<8x32xf32>
    %70 = arith.maximumf %68, %69 : vector<8x32xf32>
    %c1_31 = arith.constant 1 : index
    %c0_32 = arith.constant 0 : index
    %c0_33 = arith.constant 0 : index
    %71 = vector.load %arg4[%c1_31, %c0_32, %c0_33] : memref<2x32x32xf32, #tpu.memory_space<vmem>>, vector<1x32x32xf32>
    %72 = vector.shape_cast %71 : vector<1x32x32xf32> to vector<32x32xf32>
    %cst_34 = arith.constant dense<0.000000e+00> : vector<8x32xf32>
    %73 = tpu.matmul %70, %72, %cst_34 {dimension_numbers = #tpu.dot_dimension_numbers<[1], [0], [0], [1], [0, 0, 1, 1], [], []>} : vector<8x32xf32>, vector<32x32xf32>, vector<8x32xf32> -> vector<8x32xf32>
    %c2 = arith.constant 2 : index
    %c0_35 = arith.constant 0 : index
    %c0_36 = arith.constant 0 : index
    %74 = vector.load %arg5[%c2, %c0_35, %c0_36] : memref<3x1x32xf32, #tpu.memory_space<vmem>>, vector<1x1x32xf32>
    %75 = vector.shape_cast %74 : vector<1x1x32xf32> to vector<1x32xf32>
    %76 = vector.broadcast %75 : vector<1x32xf32> to vector<8x32xf32>
    %77 = arith.addf %73, %76 : vector<8x32xf32>
    %cst_37 = arith.constant 0.000000e+00 : f32
    %78 = vector.broadcast %cst_37 : f32 to vector<8x32xf32>
    %79 = arith.maximumf %77, %78 : vector<8x32xf32>
    %c0_i32_38 = arith.constant 0 : i32
    %80 = arith.addi %0, %c0_i32_38 : i32
    %81 = arith.index_cast %80 : i32 to index
    %82 = memref.load %arg2[%81] : memref<8xi32, #tpu.memory_space<smem>>
    %c0_i32_39 = arith.constant 0 : i32
    %c31_i32 = arith.constant 31 : i32
    %83 = arith.maxsi %c0_i32_39, %82 : i32
    %84 = arith.minsi %c31_i32, %83 : i32
    %85 = arith.index_cast %84 : i32 to index
    %c0_40 = arith.constant 0 : index
    %86 = vector.load %arg6[%85, %c0_40] : memref<32x32xf32, #tpu.memory_space<vmem>>, vector<1x32xf32>
    %c1_i32_41 = arith.constant 1 : i32
    %87 = arith.addi %0, %c1_i32_41 : i32
    %88 = arith.index_cast %87 : i32 to index
    %89 = memref.load %arg2[%88] : memref<8xi32, #tpu.memory_space<smem>>
    %c0_i32_42 = arith.constant 0 : i32
    %c31_i32_43 = arith.constant 31 : i32
    %90 = arith.maxsi %c0_i32_42, %89 : i32
    %91 = arith.minsi %c31_i32_43, %90 : i32
    %92 = arith.index_cast %91 : i32 to index
    %c0_44 = arith.constant 0 : index
    %93 = vector.load %arg6[%92, %c0_44] : memref<32x32xf32, #tpu.memory_space<vmem>>, vector<1x32xf32>
    %c2_i32_45 = arith.constant 2 : i32
    %94 = arith.addi %0, %c2_i32_45 : i32
    %95 = arith.index_cast %94 : i32 to index
    %96 = memref.load %arg2[%95] : memref<8xi32, #tpu.memory_space<smem>>
    %c0_i32_46 = arith.constant 0 : i32
    %c31_i32_47 = arith.constant 31 : i32
    %97 = arith.maxsi %c0_i32_46, %96 : i32
    %98 = arith.minsi %c31_i32_47, %97 : i32
    %99 = arith.index_cast %98 : i32 to index
    %c0_48 = arith.constant 0 : index
    %100 = vector.load %arg6[%99, %c0_48] : memref<32x32xf32, #tpu.memory_space<vmem>>, vector<1x32xf32>
    %c3_i32_49 = arith.constant 3 : i32
    %101 = arith.addi %0, %c3_i32_49 : i32
    %102 = arith.index_cast %101 : i32 to index
    %103 = memref.load %arg2[%102] : memref<8xi32, #tpu.memory_space<smem>>
    %c0_i32_50 = arith.constant 0 : i32
    %c31_i32_51 = arith.constant 31 : i32
    %104 = arith.maxsi %c0_i32_50, %103 : i32
    %105 = arith.minsi %c31_i32_51, %104 : i32
    %106 = arith.index_cast %105 : i32 to index
    %c0_52 = arith.constant 0 : index
    %107 = vector.load %arg6[%106, %c0_52] : memref<32x32xf32, #tpu.memory_space<vmem>>, vector<1x32xf32>
    %c4_i32_53 = arith.constant 4 : i32
    %108 = arith.addi %0, %c4_i32_53 : i32
    %109 = arith.index_cast %108 : i32 to index
    %110 = memref.load %arg2[%109] : memref<8xi32, #tpu.memory_space<smem>>
    %c0_i32_54 = arith.constant 0 : i32
    %c31_i32_55 = arith.constant 31 : i32
    %111 = arith.maxsi %c0_i32_54, %110 : i32
    %112 = arith.minsi %c31_i32_55, %111 : i32
    %113 = arith.index_cast %112 : i32 to index
    %c0_56 = arith.constant 0 : index
    %114 = vector.load %arg6[%113, %c0_56] : memref<32x32xf32, #tpu.memory_space<vmem>>, vector<1x32xf32>
    %c5_i32_57 = arith.constant 5 : i32
    %115 = arith.addi %0, %c5_i32_57 : i32
    %116 = arith.index_cast %115 : i32 to index
    %117 = memref.load %arg2[%116] : memref<8xi32, #tpu.memory_space<smem>>
    %c0_i32_58 = arith.constant 0 : i32
    %c31_i32_59 = arith.constant 31 : i32
    %118 = arith.maxsi %c0_i32_58, %117 : i32
    %119 = arith.minsi %c31_i32_59, %118 : i32
    %120 = arith.index_cast %119 : i32 to index
    %c0_60 = arith.constant 0 : index
    %121 = vector.load %arg6[%120, %c0_60] : memref<32x32xf32, #tpu.memory_space<vmem>>, vector<1x32xf32>
    %c6_i32_61 = arith.constant 6 : i32
    %122 = arith.addi %0, %c6_i32_61 : i32
    %123 = arith.index_cast %122 : i32 to index
    %124 = memref.load %arg2[%123] : memref<8xi32, #tpu.memory_space<smem>>
    %c0_i32_62 = arith.constant 0 : i32
    %c31_i32_63 = arith.constant 31 : i32
    %125 = arith.maxsi %c0_i32_62, %124 : i32
    %126 = arith.minsi %c31_i32_63, %125 : i32
    %127 = arith.index_cast %126 : i32 to index
    %c0_64 = arith.constant 0 : index
    %128 = vector.load %arg6[%127, %c0_64] : memref<32x32xf32, #tpu.memory_space<vmem>>, vector<1x32xf32>
    %c7_i32_65 = arith.constant 7 : i32
    %129 = arith.addi %0, %c7_i32_65 : i32
    %130 = arith.index_cast %129 : i32 to index
    %131 = memref.load %arg2[%130] : memref<8xi32, #tpu.memory_space<smem>>
    %c0_i32_66 = arith.constant 0 : i32
    %c31_i32_67 = arith.constant 31 : i32
    %132 = arith.maxsi %c0_i32_66, %131 : i32
    %133 = arith.minsi %c31_i32_67, %132 : i32
    %134 = arith.index_cast %133 : i32 to index
    %c0_68 = arith.constant 0 : index
    %135 = vector.load %arg6[%134, %c0_68] : memref<32x32xf32, #tpu.memory_space<vmem>>, vector<1x32xf32>
    %136 = tpu.concatenate %86, %93, %100, %107, %114, %121, %128, %135 in 0 : vector<1x32xf32>, vector<1x32xf32>, vector<1x32xf32>, vector<1x32xf32>, vector<1x32xf32>, vector<1x32xf32>, vector<1x32xf32>, vector<1x32xf32> -> vector<8x32xf32>
    %c0_69 = arith.constant 0 : index
    %c0_70 = arith.constant 0 : index
    %c0_71 = arith.constant 0 : index
    %137 = vector.load %arg8[%c0_69, %c0_70, %c0_71] : memref<3x1x32xf32, #tpu.memory_space<vmem>>, vector<1x1x32xf32>
    %138 = vector.shape_cast %137 : vector<1x1x32xf32> to vector<1x32xf32>
    %139 = vector.broadcast %138 : vector<1x32xf32> to vector<8x32xf32>
    %140 = arith.addf %136, %139 : vector<8x32xf32>
    %c0_72 = arith.constant 0 : index
    %c0_73 = arith.constant 0 : index
    %c0_74 = arith.constant 0 : index
    %141 = vector.load %arg7[%c0_72, %c0_73, %c0_74] : memref<2x32x32xf32, #tpu.memory_space<vmem>>, vector<1x32x32xf32>
    %142 = vector.shape_cast %141 : vector<1x32x32xf32> to vector<32x32xf32>
    %cst_75 = arith.constant dense<0.000000e+00> : vector<8x32xf32>
    %143 = tpu.matmul %140, %142, %cst_75 {dimension_numbers = #tpu.dot_dimension_numbers<[1], [0], [0], [1], [0, 0, 1, 1], [], []>} : vector<8x32xf32>, vector<32x32xf32>, vector<8x32xf32> -> vector<8x32xf32>
    %c1_76 = arith.constant 1 : index
    %c0_77 = arith.constant 0 : index
    %c0_78 = arith.constant 0 : index
    %144 = vector.load %arg8[%c1_76, %c0_77, %c0_78] : memref<3x1x32xf32, #tpu.memory_space<vmem>>, vector<1x1x32xf32>
    %145 = vector.shape_cast %144 : vector<1x1x32xf32> to vector<1x32xf32>
    %146 = vector.broadcast %145 : vector<1x32xf32> to vector<8x32xf32>
    %147 = arith.addf %143, %146 : vector<8x32xf32>
    %cst_79 = arith.constant 0.000000e+00 : f32
    %148 = vector.broadcast %cst_79 : f32 to vector<8x32xf32>
    %149 = arith.maximumf %147, %148 : vector<8x32xf32>
    %c1_80 = arith.constant 1 : index
    %c0_81 = arith.constant 0 : index
    %c0_82 = arith.constant 0 : index
    %150 = vector.load %arg7[%c1_80, %c0_81, %c0_82] : memref<2x32x32xf32, #tpu.memory_space<vmem>>, vector<1x32x32xf32>
    %151 = vector.shape_cast %150 : vector<1x32x32xf32> to vector<32x32xf32>
    %cst_83 = arith.constant dense<0.000000e+00> : vector<8x32xf32>
    %152 = tpu.matmul %149, %151, %cst_83 {dimension_numbers = #tpu.dot_dimension_numbers<[1], [0], [0], [1], [0, 0, 1, 1], [], []>} : vector<8x32xf32>, vector<32x32xf32>, vector<8x32xf32> -> vector<8x32xf32>
    %c2_84 = arith.constant 2 : index
    %c0_85 = arith.constant 0 : index
    %c0_86 = arith.constant 0 : index
    %153 = vector.load %arg8[%c2_84, %c0_85, %c0_86] : memref<3x1x32xf32, #tpu.memory_space<vmem>>, vector<1x1x32xf32>
    %154 = vector.shape_cast %153 : vector<1x1x32xf32> to vector<1x32xf32>
    %155 = vector.broadcast %154 : vector<1x32xf32> to vector<8x32xf32>
    %156 = arith.addf %152, %155 : vector<8x32xf32>
    %cst_87 = arith.constant 0.000000e+00 : f32
    %157 = vector.broadcast %cst_87 : f32 to vector<8x32xf32>
    %158 = arith.maximumf %156, %157 : vector<8x32xf32>
    %159 = arith.mulf %79, %158 : vector<8x32xf32>
    %cst_88 = arith.constant dense<0.000000e+00> : vector<8xf32>
    %160 = vector.multi_reduction <add>, %159, %cst_88 [1] : vector<8x32xf32> to vector<8xf32>
    %161 = vector.shape_cast %160 : vector<8xf32> to vector<8x1xf32>
    %162 = arith.mulf %79, %79 : vector<8x32xf32>
    %cst_89 = arith.constant dense<0.000000e+00> : vector<8xf32>
    %163 = vector.multi_reduction <add>, %162, %cst_89 [1] : vector<8x32xf32> to vector<8xf32>
    %164 = vector.shape_cast %163 : vector<8xf32> to vector<8x1xf32>
    %165 = arith.mulf %158, %158 : vector<8x32xf32>
    %cst_90 = arith.constant dense<0.000000e+00> : vector<8xf32>
    %166 = vector.multi_reduction <add>, %165, %cst_90 [1] : vector<8x32xf32> to vector<8xf32>
    %167 = vector.shape_cast %166 : vector<8xf32> to vector<8x1xf32>
    %168 = arith.mulf %164, %167 : vector<8x1xf32>
    %cst_91 = arith.constant 9.99999993E-9 : f32
    %cst_92 = arith.constant 9.99999993E-9 : f32
    %169 = arith.mulf %cst_91, %cst_92 : f32
    %170 = vector.broadcast %169 : f32 to vector<8x1xf32>
    %171 = arith.maximumf %168, %170 : vector<8x1xf32>
    %172 = math.rsqrt %171 : vector<8x1xf32>
    %173 = arith.mulf %161, %172 : vector<8x1xf32>
    %cst_93 = arith.constant 9.99999997E-7 : f32
    %174 = vector.broadcast %cst_93 : f32 to vector<8x1xf32>
    %175 = arith.cmpf olt, %173, %174 : vector<8x1xf32>
    %cst_94 = arith.constant 9.99999997E-7 : f32
    %176 = vector.broadcast %cst_94 : f32 to vector<8x1xf32>
    %177 = arith.select %175, %176, %173 : vector<8x1xi1>, vector<8x1xf32>
    %178 = vector.shape_cast %177 : vector<8x1xf32> to vector<8x1xf32>
    %179 = vector.broadcast %178 : vector<8x1xf32> to vector<8x128xf32>
    %c0_95 = arith.constant 0 : index
    %c0_96 = arith.constant 0 : index
    %180 = vector.load %arg9[%c0_95, %c0_96] : memref<8x128xf32, #tpu.memory_space<vmem>>, vector<8x128xf32>
    tpu.vector_store %arg9[%c0_95, %c0_96], %179 {strides = array<i32>} : memref<8x128xf32, #tpu.memory_space<vmem>>, vector<8x128xf32>,
    return
  }
  func.func @transform_0(%arg0: i32, %arg1: memref<8xi32, #tpu.memory_space<smem>>, %arg2: memref<8xi32, #tpu.memory_space<smem>>) -> (i32, i32) {
    %c0_i32 = arith.constant 0 : i32
    %c0_i32_0 = arith.constant 0 : i32
    %c0_i32_1 = arith.constant 0 : i32
    return %c0_i32, %c0_i32_0 : i32, i32
  }
  func.func @transform_1(%arg0: i32, %arg1: memref<8xi32, #tpu.memory_space<smem>>, %arg2: memref<8xi32, #tpu.memory_space<smem>>) -> (i32, i32, i32) {
    %c0_i32 = arith.constant 0 : i32
    %c0_i32_0 = arith.constant 0 : i32
    %c0_i32_1 = arith.constant 0 : i32
    %c0_i32_2 = arith.constant 0 : i32
    return %c0_i32, %c0_i32_0, %c0_i32_1 : i32, i32, i32
  }
  func.func @transform_2(%arg0: i32, %arg1: memref<8xi32, #tpu.memory_space<smem>>, %arg2: memref<8xi32, #tpu.memory_space<smem>>) -> (i32, i32, i32) {
    %c0_i32 = arith.constant 0 : i32
    %c0_i32_0 = arith.constant 0 : i32
    %c0_i32_1 = arith.constant 0 : i32
    %c0_i32_2 = arith.constant 0 : i32
    return %c0_i32, %c0_i32_0, %c0_i32_1 : i32, i32, i32
  }
  func.func @transform_3(%arg0: i32, %arg1: memref<8xi32, #tpu.memory_space<smem>>, %arg2: memref<8xi32, #tpu.memory_space<smem>>) -> (i32, i32) {
    %c0_i32 = arith.constant 0 : i32
    %c0_i32_0 = arith.constant 0 : i32
    %c0_i32_1 = arith.constant 0 : i32
    return %c0_i32, %c0_i32_0 : i32, i32
  }
  func.func @transform_4(%arg0: i32, %arg1: memref<8xi32, #tpu.memory_space<smem>>, %arg2: memref<8xi32, #tpu.memory_space<smem>>) -> (i32, i32, i32) {
    %c0_i32 = arith.constant 0 : i32
    %c0_i32_0 = arith.constant 0 : i32
    %c0_i32_1 = arith.constant 0 : i32
    %c0_i32_2 = arith.constant 0 : i32
    return %c0_i32, %c0_i32_0, %c0_i32_1 : i32, i32, i32
  }
  func.func @transform_5(%arg0: i32, %arg1: memref<8xi32, #tpu.memory_space<smem>>, %arg2: memref<8xi32, #tpu.memory_space<smem>>) -> (i32, i32, i32) {
    %c0_i32 = arith.constant 0 : i32
    %c0_i32_0 = arith.constant 0 : i32
    %c0_i32_1 = arith.constant 0 : i32
    %c0_i32_2 = arith.constant 0 : i32
    return %c0_i32, %c0_i32_0, %c0_i32_1 : i32, i32, i32
  }
  func.func @transform_6(%arg0: i32, %arg1: memref<8xi32, #tpu.memory_space<smem>>, %arg2: memref<8xi32, #tpu.memory_space<smem>>) -> (i32, i32) {
    %c0_i32 = arith.constant 0 : i32
    %c0_i32_0 = arith.constant 0 : i32
    return %arg0, %c0_i32 : i32, i32
  }
}

</mosaic_0001>

<bundles_post_ra>
// kernel: tpu_custom_call.1
= control target key start
LH: loop header
LB: loop body
LE: loop exit
PB: predicated region body
PF: predicated region fallthrough
CT: control target
= control target key end

     0   :  { %s1034_s27 = smov [#allocation3]   ;;  %s1237_s0 = inlined_call_operand.hbm [shape: s32[8], index: 0, kind: input, shape index: {}]   ;;  %s1238_s2 = inlined_call_operand.hbm [shape: f32[16,32], index: 2, kind: input, shape index: {}]   ;;  %s1239_s3 = inlined_call_operand.hbm [shape: f32[2,32,32], index: 3, kind: input, shape index: {}]   ;;  %s1240_s4 = inlined_call_operand.vmem [shape: f32[3,1,32], index: 4, kind: input, shape index: {}]   ;;  %s1241_s5 = inlined_call_operand.hbm [shape: f32[32,32], index: 5, kind: input, shape index: {}]   ;;  %s1242_s6 = inlined_call_operand.hbm [shape: f32[2,32,32], index: 6, kind: input, shape index: {}]   ;;  %s1243_s7 = inlined_call_operand.vmem [shape: f32[3,1,32], index: 7, kind: input, shape index: {}]   ;;  %s1244_s8 = inlined_call_operand.hbm [shape: f32[8,128], index: 8, kind: output, shape index: {}]   ;;  %s1245_s1 = inlined_call_operand.vmem [shape: s32[8], index: 1, kind: input, shape index: {}]  }
   0x1   :  { %14 = dma.hbm_to_smem %s1237_s0, 16, %s1034_s27, [#allocation2] }
   0x2   :  { %s15_s10 = sshll.u32 %s1245_s1, 4  ;;  %s16_s10 = int_to_ptr.vmem [resolvable:$true] %s15_s10 }
   0x3   :  { %s912_s11 = scalar_lea.vmem %s16_s10, 16  ;;  %p917_p1 = scmp.lt.s32.totalorder %s16_s10, %s16_s10 }
   0x4   :  { %p913_p0 = scmp.ne.s32.totalorder %s16_s10, %s912_s11  ;;  %p918_p2 = scmp.lt.s32.totalorder %s912_s11, %s912_s11 }
   0x6   :  { %p919_p3 = por %p918_p2, %p917_p1 }
   0x8   :  { %p920_p4 = pnand %p919_p3, %p913_p0 }
   0xa   :  { %923 = shalt.err (!%p920_p4)  }
   0xb   :  { %s1035_s12 = smov [#allocation4]  }
   0xc   :  { %18 = dma.vmem_to_smem %s16_s10, 16, %s1035_s12, [#allocation2] }
   0xd   :  { %1024 = dma.done.wait [#allocation2], 32 }
   0xe   :  { %1025 = vsyncadd [#allocation2], 4294967264 }
   0xf   :  { %20 = sfence }
  0x10   :  { %21 = vsyncpa [#allocation6], 0 }
  0x11   :  { %22 = vsyncpa [#allocation9], 0 }
  0x12   :  { %23 = vsyncpa [#allocation12], 0 }
  0x13   :  { %24 = vsyncpa [#allocation7], 0  ;;  %s1036_s0 = smov [#allocation8]   ;;  %s1037_s1 = smov [#allocation5]  }
  0x14   :  { %s42_s13 = sshll.u32 %s1036_s0, 4  ;;  %s30_s14 = sshll.u32 %s1037_s1, 4  ;;  %s43_s13 = int_to_ptr.vmem [resolvable:$true] %s42_s13  ;;  %s31_s14 = int_to_ptr.vmem [resolvable:$true] %s30_s14 }
  0x15   :  { %s932_s15 = scalar_lea.vmem %s43_s13, 1024  ;;  %p937_p6 = scmp.lt.s32.totalorder %s43_s13, %s43_s13 }
  0x16   :  { %p933_p5 = scmp.ne.s32.totalorder %s43_s13, %s932_s15  ;;  %p938_p7 = scmp.lt.s32.totalorder %s932_s15, %s932_s15 }
  0x18   :  { %p939_p8 = por %p938_p7, %p937_p6 }
  0x1a   :  { %p940_p9 = pnand %p939_p8, %p933_p5 }
  0x1c   :  { %943 = shalt.err (!%p940_p9)
}
  0x1d   :  { %s1038_s16 = smov 128   ;;  %s1039_s17 = smov 8  }
  0x1e   :  { %48 = dma.hbm_to_vmem [thread:$0]  %s1239_s3, 1024, %s43_s13, [#allocation9], %s1038_s16, %s1038_s16, %s1039_s17  }
  0x1f   :  { %s952_s20 = scalar_lea.vmem %s31_s14, 256  ;;  %p957_p11 = scmp.lt.s32.totalorder %s31_s14, %s31_s14 }
  0x20   :  { %p953_p10 = scmp.ne.s32.totalorder %s31_s14, %s952_s20  ;;  %p958_p12 = scmp.lt.s32.totalorder %s952_s20, %s952_s20 }
  0x22   :  { %p959_p13 = por %p958_p12, %p957_p11 }
  0x24   :  { %p960_p0 = pnand %p959_p13, %p953_p10 }
  0x26   :  { %963 = shalt.err (!%p960_p0)
}
  0x27   :  { %36 = dma.hbm_to_vmem [thread:$0]  %s1238_s2, 256, %s31_s14, [#allocation6], %s1038_s16, %s1038_s16, %s1039_s17  }
  0x28   :  { %s1040_s23 = smov [#allocation10]   ;;  %s1041_s25 = smov [#allocation11]  }
  0x29   :  { %s56_s24 = sshll.u32 %s1040_s23, 4  ;;  %s68_s26 = sshll.u32 %s1041_s25, 4  ;;  %s57_s24 = int_to_ptr.vmem [resolvable:$true] %s56_s24  ;;  %s69_s26 = int_to_ptr.vmem [resolvable:$true] %s68_s26 }
  0x2a   :  { %s972_s3 = scalar_lea.vmem %s57_s24, 512  ;;  %p977_p2 = scmp.lt.s32.totalorder %s57_s24, %s57_s24 }
  0x2b   :  { %p973_p1 = scmp.ne.s32.totalorder %s57_s24, %s972_s3  ;;  %p978_p3 = scmp.lt.s32.totalorder %s972_s3, %s972_s3 }
  0x2d   :  { %p979_p4 = por %p978_p3, %p977_p2 }
  0x2f   :  { %p980_p5 = pnand %p979_p4, %p973_p1 }
  0x31   :  { %983 = shalt.err (!%p980_p5)
}
  0x32   :  { %62 = dma.hbm_to_vmem [thread:$0]  %s1241_s5, 512, %s57_s24, [#allocation9], %s1038_s16, %s1038_s16, %s1039_s17  }
  0x33   :  { %s992_s2 = scalar_lea.vmem %s69_s26, 1024  ;;  %p997_p7 = scmp.lt.s32.totalorder %s69_s26, %s69_s26 }
  0x34   :  { %p993_p6 = scmp.ne.s32.totalorder %s69_s26, %s992_s2  ;;  %p998_p8 = scmp.lt.s32.totalorder %s992_s2, %s992_s2 }
  0x36   :  { %p999_p9 = por %p998_p8, %p997_p7 }
  0x38   :  { %p1000_p10 = pnand %p999_p9, %p993_p6 }
  0x3a   :  { %1003 = shalt.err (!%p1000_p10)
}
  0x3b   :  { %74 = dma.hbm_to_vmem [thread:$0]  %s1242_s6, 1024, %s69_s26, [#allocation12], %s1038_s16, %s1038_s16, %s1039_s17  }
  0x3c   :  { %1026 = dma.done.wait [#allocation6], 256  }
  0x3d   :  { %1027 = vsyncadd [#allocation6], 4294967040 }
  0x3e   :  { %1028 = dma.done.wait [#allocation9], 1536  }
  0x3f   :  { %1029 = vsyncadd [#allocation9], 4294965760 }
  0x40   :  { %1030 = dma.done.wait [#allocation12], 1024  }
  0x41   :  { %1031 = vsyncadd [#allocation12], 4294966272  ;;  %v1042_v0 = vmov 0.0   ;;  %vm1043_vm0 = vmmov 0   ;;  %s90_s5 = sld [smem:[#allocation3]]  ;;  %v199_v1 = vld [vmem:[#allocation8 + $0x18] sm:$0xff] }
  0x42   :  { %847 = vmatprep.subr.mxu0 %v1042_v0  ;;  %855 = vmatprep.mubr.msk.f32.mxu0 %vm1043_vm0, %v1042_v0  ;;  %s692_s9 = sld [smem:[#allocation3 + $0x1]]  ;;  %v198_v2 = vld [vmem:[#allocation8 + $0x10] sm:$0xff]  ;;  %v197_v3 = vld [vmem:[#allocation8 + $0x8] sm:$0xff]  ;;  %v287_v4 = vld [vmem:[#allocation8 + $0x38] sm:$0xff]  ;;  %vm174_vm1 = vcmask 1040384   ;;  %vm176_vm2 = vcmask 1041408  }
  0x43   :  { %858 = vmatprep.subr.mxu1 %v1042_v0  ;;  %866 = vmatprep.mubr.msk.f32.mxu1 %vm1043_vm0, %v1042_v0  ;;  %s1126_s6 = sld [smem:[#allocation3 + $0x2]]  ;;  %v286_v5 = vld [vmem:[#allocation8 + $0x30] sm:$0xff]  ;;  %v196_v6 = vld [vmem:[#allocation8] sm:$0xff]  ;;  %vm178_vm3 = vcmask 1042432   ;;  %vm180_vm4 = vcmask 1043456   ;;  %vm182_vm5 = vcmask 1044480  }
  0x44   :  { %s1128_s10 = sld [smem:[#allocation3 + $0x3]]  ;;  %848 = vmatpush3.msra.mxu0 %v199_v1  ;;  %859 = vmatpush3.msra.mxu1 %v287_v4  ;;  %vm184_vm6 = vcmask 1045504   ;;  %vm186_vm7 = vcmask 1046528   ;;  %v734_v28 = vld [vmem:[%s1240_s4] ss:$0 sm:$0xff]  ;;  %vm208_vm8 = vcmask 261120  }
  0x45   :  { %s1130_s11 = sld [smem:[#allocation3 + $0x4]]  ;;  %849 = vmatprep.subr.mxu0 %v1042_v0  ;;  %860 = vmatprep.subr.mxu1 %v1042_v0  ;;  %v465_v31 = vld [vmem:[#allocation11 + $0x18] sm:$0xff]  ;;  %v464_v32 = vld [vmem:[#allocation11 + $0x10] sm:$0xff]  ;;  %v463_v33 = vld [vmem:[#allocation11 + $0x8] sm:$0xff] }
  0x46   :  { %s1132_s12 = sld [smem:[#allocation3 + $0x5]]  ;;  %850 = vmatpush3.msra.mxu0 %v198_v2  ;;  %861 = vmatpush3.msra.mxu1 %v286_v5  ;;  %v462_v34 = vld [vmem:[#allocation11] sm:$0xff]  ;;  %v788_v56 = vld [vmem:[%s1243_s7] ss:$0 sm:$0xff]  ;;  %v285_v59 = vld [vmem:[#allocation8 + $0x28] sm:$0xff] }
  0x47   :  { %p91_p11 = scmp.gt.s32.totalorder %s90_s5, 0  ;;  %p687_p12 = scmp.lt.s32.totalorder %s90_s5, 15  ;;  %851 = vmatprep.subr.mxu0 %v1042_v0  ;;  %862 = vmatprep.subr.mxu1 %v1042_v0  ;;  %v284_v60 = vld [vmem:[#allocation8 + $0x20] sm:$0xff]  ;;  %v736_v61 = vld [vmem:[%s1240_s4 + $0x1] ss:$0 sm:$0xff]  ;;  %v550_v5 = vld [vmem:[#allocation11 + $0x28] sm:$0xff] }
  0x48   :  { %p99_p13 = scmp.gt.s32.totalorder %s692_s9, 0  ;;  %p693_p0 = scmp.lt.s32.totalorder %s692_s9, 15  ;;  %852 = vmatpush3.msra.mxu0 %v197_v3  ;;  %863 = vmatpush3.msra.mxu1 %v285_v59  ;;  %v552_v3 = vld [vmem:[#allocation11 + $0x38] sm:$0xff]  ;;  %v551_v4 = vld [vmem:[#allocation11 + $0x30] sm:$0xff] }
  0x49   :  { %s1247_s5 = smov (!%p91_p11, %s90_s5), 0  ;;  %853 = vmatprep.subr.mxu0 %v1042_v0  ;;  %p107_p1 = scmp.gt.s32.totalorder %s1126_s6, 0  ;;  %864 = vmatprep.subr.mxu1 %v1042_v0 }
  0x4a   :  { %s1249_s9 = smov (!%p99_p13, %s692_s9), 0  ;;  %s1251_s5 = smov (!%p687_p12, %s1247_s5), 15  ;;  %854 = vmatpush3.msra.mxu0 %v196_v6  ;;  %865 = vmatpush3.msra.mxu1 %v284_v60  ;;  %v549_v6 = vld [vmem:[#allocation11 + $0x20] sm:$0xff] }
  0x4b   :  { %s1253_s9 = smov (!%p693_p0, %s1249_s9), 15  ;;  %p699_p2 = scmp.lt.s32.totalorder %s1126_s6, 15  ;;  %869 = vmatprep.subr.mxu0 %v1042_v0  ;;  %880 = vmatprep.subr.mxu1 %v1042_v0 }
  0x4c   :  { %s1255_s6 = smov (!%p107_p1, %s1126_s6), 0  ;;  %p115_p3 = scmp.gt.s32.totalorder %s1128_s10, 0 }
  0x4d   :  { %p705_p4 = scmp.lt.s32.totalorder %s1128_s10, 15  ;;  %s1257_s6 = smov (!%p699_p2, %s1255_s6), 15 }
  0x4e   :  { %s1259_s10 = smov (!%p115_p3, %s1128_s10), 0  ;;  %p123_p5 = scmp.gt.s32.totalorder %s1130_s11, 0 }
  0x4f   :  { %s103_s0 = scalar_lea.vmem [#allocation5], %s1253_s9  ;;  %s1261_s10 = smov (!%p705_p4, %s1259_s10), 15 }
  0x50   :  { %v104_v7 = vld [vmem:[%s103_s0] sm:$0x1]  ;;  %s124_s13 = scalar_select %p123_p5, %s1130_s11, 0 }
  0x51   :  { %p711_p6 = scmp.lt.s32.totalorder %s1130_s11, 15  ;;  %s111_s1 = scalar_lea.vmem [#allocation5], %s1257_s6  ;;  %v154_v9 = vrot.slane %v104_v7, 7  ;;  %v790_v7 = vld [vmem:[%s1243_s7 + $0x1] ss:$0 sm:$0xff] }
  0x52   :  { %v112_v8 = vld [vmem:[%s111_s1] sm:$0x1]  ;;  %p131_p7 = scmp.gt.s32.totalorder %s1132_s12, 0  ;;  %p717_p8 = scmp.lt.s32.totalorder %s1132_s12, 15 }
  0x53   :  { %s95_s14 = scalar_lea.vmem [#allocation5], %s1251_s5  ;;  %s1263_s13 = smov (!%p711_p6, %s124_s13), 15  ;;  %v157_v12 = vrot.slane %v112_v8, 6 }
  0x54   :  { %v96_v10 = vld [vmem:[%s95_s14] sm:$0x1]  ;;  %s1265_s12 = smov (!%p131_p7, %s1132_s12), 0  ;;  %s119_s15 = scalar_lea.vmem [#allocation5], %s1261_s10 }
  0x55   :  { %v120_v11 = vld [vmem:[%s119_s15] sm:$0x1]  ;;  %s722_s16 = sld [smem:[#allocation3 + $0x6]]  ;;  %s1267_s12 = smov (!%p717_p8, %s1265_s12), 15  ;;  %v175_v13 = vsel %vm174_vm1, %v96_v10, %v154_v9 }
  0x56   :  { %s728_s17 = sld [smem:[#allocation3 + $0x7]]  ;;  %s127_s18 = scalar_lea.vmem [#allocation5], %s1263_s13  ;;  %v160_v15 = vrot.slane %v120_v11, 5  ;;  %v177_v16 = vsel %vm176_vm2, %v175_v13, %v157_v12  ;;  %v739_v12 = vld [vmem:[%s1240_s4 + $0x2] ss:$0 sm:$0xff] }
  0x57   :  { %v128_v14 = vld [vmem:[%s127_s18] sm:$0x1]  ;;  %s1156_s19 = sld [smem:[#allocation4]]  ;;  %s135_s22 = scalar_lea.vmem [#allocation5], %s1267_s12 }
  0x58   :  { %s1159_s20 = sld [smem:[#allocation4 + $0x1]]  ;;  %v136_v17 = vld [vmem:[%s135_s22] sm:$0x1]  ;;  %v163_v18 = vrot.slane %v128_v14, 4  ;;  %v179_v19 = vsel %vm178_vm3, %v177_v16, %v160_v15  ;;  %s1044_s4 = smov [#allocation13]  }
  0x59   :  { %s1161_s21 = sld [smem:[#allocation4 + $0x2]]  ;;  %v166_v20 = vrot.slane %v136_v17, 3 }
  0x5a   :  { %s1164_s23 = sld [smem:[#allocation4 + $0x3]]  ;;  %v181_v21 = vsel %vm180_vm4, %v179_v19, %v163_v18  ;;  %v793_v18 = vld [vmem:[%s1243_s7 + $0x2] ss:$0 sm:$0xff]  ;;  %s660_s7 = sshll.u32 %s1044_s4, 4  ;;  %s661_s7 = int_to_ptr.vmem [resolvable:$true] %s660_s7 }
  0x5b   :  { %p139_p9 = scmp.gt.s32.totalorder %s722_s16, 0  ;;  %p723_p10 = scmp.lt.s32.totalorder %s722_s16, 15  ;;  %v183_v23 = vsel %vm182_vm5, %v181_v21, %v166_v20 }
  0x5c   :  { %p147_p11 = scmp.gt.s32.totalorder %s728_s17, 0  ;;  %p729_p12 = scmp.lt.s32.totalorder %s728_s17, 15 }
  0x5d   :  { %s1269_s16 = smov (!%p139_p9, %s722_s16), 0  ;;  %p371_p13 = scmp.gt.s32.totalorder %s1156_s19, 0 }
  0x5e   :  { %s1271_s16 = smov (!%p723_p10, %s1269_s16), 15  ;;  %s1273_s17 = smov (!%p147_p11, %s728_s17), 0 }
  0x5f   :  { %s143_s24 = scalar_lea.vmem [#allocation5], %s1271_s16  ;;  %s1275_s17 = smov (!%p729_p12, %s1273_s17), 15 }
  0x60   :  { %v144_v22 = vld [vmem:[%s143_s24] sm:$0x1]  ;;  %s372_s25 = scalar_select %p371_p13, %s1156_s19, 0 }
  0x61   :  { %v169_v24 = vrot.slane %v144_v22, 2  ;;  %p741_p0 = scmp.lt.s32.totalorder %s1156_s19, 31  ;;  %s151_s26 = scalar_lea.vmem [#allocation5], %s1275_s17 }
  0x62   :  { %v152_v25 = vld [vmem:[%s151_s26] sm:$0x1]  ;;  %p378_p1 = scmp.gt.s32.totalorder %s1159_s20, 0  ;;  %p747_p2 = scmp.lt.s32.totalorder %s1159_s20, 31 }
  0x63   :  { %v185_v26 = vsel %vm184_vm6, %v183_v23, %v169_v24  ;;  %v172_v27 = vrot.slane %v152_v25, 1  ;;  %s1277_s25 = smov (!%p741_p0, %s372_s25), 31  ;;  %p385_p3 = scmp.gt.s32.totalorder %s1161_s21, 0 }
  0x64   :  { %s1279_s20 = smov (!%p378_p1, %s1159_s20), 0  ;;  %p753_p4 = scmp.lt.s32.totalorder %s1161_s21, 31 }
  0x65   :  { %v187_v29 = vsel %vm186_vm7, %v185_v26, %v172_v27  ;;  %s1281_s20 = smov (!%p747_p2, %s1279_s20), 31  ;;  %p392_p5 = scmp.gt.s32.totalorder %s1164_s23, 0 }
  0x66   :  { %v195_v30 = vadd.f32 %v734_v28, %v187_v29  ;;  %s386_s28 = scalar_select %p385_p3, %s1161_s21, 0 }
  0x67   :  { %p759_p6 = scmp.lt.s32.totalorder %s1164_s23, 31  ;;  %s1285_s23 = smov (!%p392_p5, %s1164_s23), 0 }
  0x68   :  { %856 = vmatmul.mubr.msk.f32.vlgmr.msra.gmra.mxu0 %vm208_vm8, %v195_v30  ;;  %s1283_s28 = smov (!%p753_p4, %s386_s28), 31  ;;  %s764_s2 = sld [smem:[#allocation4 + $0x4]] }
  0x69   :  { %870 = vmatpush3.msra.mxu0 %v465_v31  ;;  %877 = vmatprep.mubr.msk.f32.mxu0 %vm1043_vm0, %v1042_v0  ;;  %s382_s29 = scalar_lea.vmem [#allocation10], %s1281_s20  ;;  %s1287_s23 = smov (!%p759_p6, %s1285_s23), 31 }
  0x6a   :  { %871 = vmatprep.subr.mxu0 %v1042_v0  ;;  %v383_v35 = vld [vmem:[%s382_s29] sm:$0x1]  ;;  %s770_s30 = sld [smem:[#allocation4 + $0x5]]  ;;  %s389_s5 = scalar_lea.vmem [#allocation10], %s1283_s28 }
  0x6b   :  { %872 = vmatpush3.msra.mxu0 %v464_v32  ;;  %v390_v36 = vld [vmem:[%s389_s5] sm:$0x1]  ;;  %s1193_s9 = sld [smem:[#allocation4 + $0x6]]  ;;  %v427_v37 = vrot.slane %v383_v35, 7  ;;  %s375_s6 = scalar_lea.vmem [#allocation10], %s1277_s25 }
  0x6c   :  { %873 = vmatprep.subr.mxu0 %v1042_v0  ;;  %v376_v38 = vld [vmem:[%s375_s6] sm:$0x1]  ;;  %s396_s10 = scalar_lea.vmem [#allocation10], %s1287_s23  ;;  %s782_s11 = sld [smem:[#allocation4 + $0x7]]  ;;  %v430_v40 = vrot.slane %v390_v36, 6 }
  0x6d   :  { %874 = vmatpush3.msra.mxu0 %v463_v33  ;;  %v397_v39 = vld [vmem:[%s396_s10] sm:$0x1]  ;;  %v447_v41 = vsel %vm174_vm1, %v376_v38, %v427_v37  ;;  %s1004_s25 = scalar_lea.vmem %s661_s7, 128  ;;  %p1009_p2 = scmp.lt.s32.totalorder %s661_s7, %s661_s7 }
  0x6e   :  { %875 = vmatprep.subr.mxu0 %v1042_v0  ;;  %p399_p7 = scmp.gt.s32.totalorder %s764_s2, 0  ;;  %p765_p8 = scmp.lt.s32.totalorder %s764_s2, 31  ;;  %v433_v42 = vrot.slane %v397_v39, 5  ;;  %v448_v43 = vsel %vm176_vm2, %v447_v41, %v430_v40 }
  0x6f   :  { %876 = vmatpush3.msra.mxu0 %v462_v34  ;;  %p1005_p1 = scmp.ne.s32.totalorder %s661_s7, %s1004_s25  ;;  %p1010_p3 = scmp.lt.s32.totalorder %s1004_s25, %s1004_s25 }
  0x70   :  { %s1289_s2 = smov (!%p399_p7, %s764_s2), 0  ;;  %p406_p9 = scmp.gt.s32.totalorder %s770_s30, 0  ;;  %v449_v46 = vsel %vm178_vm3, %v448_v43, %v433_v42 }
  0x71   :  { %p771_p10 = scmp.lt.s32.totalorder %s770_s30, 31  ;;  %s1291_s2 = smov (!%p765_p8, %s1289_s2), 31 }
  0x72   :  { %s1293_s30 = smov (!%p406_p9, %s770_s30), 0  ;;  %p413_p11 = scmp.gt.s32.totalorder %s1193_s9, 0 }
  0x73   :  { %s403_s12 = scalar_lea.vmem [#allocation10], %s1291_s2  ;;  %s1295_s30 = smov (!%p771_p10, %s1293_s30), 31 }
  0x74   :  { %v404_v44 = vld [vmem:[%s403_s12] sm:$0x1]  ;;  %s414_s0 = scalar_select %p413_p11, %s1193_s9, 0 }
  0x75   :  { %v436_v45 = vrot.slane %v404_v44, 4  ;;  %p777_p12 = scmp.lt.s32.totalorder %s1193_s9, 31  ;;  %s410_s13 = scalar_lea.vmem [#allocation10], %s1295_s30 }
  0x76   :  { %v411_v47 = vld [vmem:[%s410_s13] sm:$0x1]  ;;  %p420_p13 = scmp.gt.s32.totalorder %s782_s11, 0  ;;  %p783_p0 = scmp.lt.s32.totalorder %s782_s11, 31 }
  0x77   :  { %s1297_s0 = smov (!%p777_p12, %s414_s0), 31  ;;  %v439_v48 = vrot.slane %v411_v47, 3  ;;  %v450_v49 = vsel %vm180_vm4, %v449_v46, %v436_v45  ;;  %p1011_p4 = por %p1010_p3, %p1009_p2 }
  0x78   :  { %s1299_s11 = smov (!%p420_p13, %s782_s11), 0  ;;  %s417_s1 = scalar_lea.vmem [#allocation10], %s1297_s0 }
  0x79   :  { %v418_v50 = vld [vmem:[%s417_s1] sm:$0x1]  ;;  %s1301_s11 = smov (!%p783_p0, %s1299_s11), 31  ;;  %v451_v51 = vsel %vm182_vm5, %v450_v49, %v439_v48  ;;  %p1012_p5 = pnand %p1011_p4, %p1005_p1 }
  0x7a   :  { %v442_v52 = vrot.slane %v418_v50, 2  ;;  %s424_s14 = scalar_lea.vmem [#allocation10], %s1301_s11 }
  0x7b   :  { %v425_v53 = vld [vmem:[%s424_s14] sm:$0x1] }
  0x7c   :  { %v452_v54 = vsel %vm184_vm6, %v451_v51, %v442_v52  ;;  %v445_v55 = vrot.slane %v425_v53, 1 }
  0x7e   :  { %v453_v57 = vsel %vm186_vm7, %v452_v54, %v445_v55 }
  0x7f   :  { %v461_v58 = vadd.f32 %v788_v56, %v453_v57 }
  0x81   :  { %878 = vmatmul.mubr.msk.f32.vlgmr.msra.gmra.mxu0 %vm208_vm8, %v461_v58 }
 0x128   :  { %v278_v62 = vpop.f32.mrf.mxu0 }
 0x129   :  { %v279_v63 = vadd.f32 %v736_v61, %v278_v62 }
 0x12a   :  { %v857_v1 = vpop.f32.mrf.mxu0 }
 0x12b   :  { %v282_v2 = vmax.f32 %v279_v63, 0.0 }
 0x12d   :  { %867 = vmatmul.mubr.msk.f32.vlgmr.msra.gmra.mxu1 %vm208_vm8, %v282_v2 }
 0x12e   :  { %881 = vmatpush3.msra.mxu1 %v552_v3  ;;  %888 = vmatprep.mubr.msk.f32.mxu1 %vm1043_vm0, %v1042_v0 }
 0x12f   :  { %882 = vmatprep.subr.mxu1 %v1042_v0 }
 0x130   :  { %883 = vmatpush3.msra.mxu1 %v551_v4 }
 0x131   :  { %884 = vmatprep.subr.mxu1 %v1042_v0 }
 0x132   :  { %885 = vmatpush3.msra.mxu1 %v550_v5 }
 0x133   :  { %886 = vmatprep.subr.mxu1 %v1042_v0 }
 0x134   :  { %887 = vmatpush3.msra.mxu1 %v549_v6 }
 0x141   :  { %v543_v8 = vpop.f32.mrf.mxu0 }
 0x142   :  { %v544_v9 = vadd.f32 %v790_v7, %v543_v8 }
 0x143   :  { %v879_v10 = vpop.f32.mrf.mxu0 }
 0x144   :  { %v547_v11 = vmax.f32 %v544_v9, 0.0 }
 0x146   :  { %889 = vmatmul.mubr.msk.f32.vlgmr.msra.gmra.mxu1 %vm208_vm8, %v547_v11 }
 0x1ed   :  { %v365_v13 = vpop.f32.mrf.mxu1 }
 0x1ee   :  { %v366_v14 = vadd.f32 %v739_v12, %v365_v13 }
 0x1ef   :  { %v868_v15 = vpop.f32.mrf.mxu1 }
 0x1f0   :  { %v369_v16 = vmax.f32 %v366_v14, 0.0 }
 0x1f2   :  { %v639_v0 = vmul.f32 %v369_v16, %v369_v16 }
 0x1f4   :  { %v640_v17 = vsel %vm208_vm8, %v639_v0, 0.0 }
 0x1f5   :  { %641 = vadd.xlane.f32.xlu0 %v640_v17 }
 0x206   :  { %v630_v19 = vpop.f32.mrf.mxu1 }
 0x207   :  { %v631_v20 = vadd.f32 %v793_v18, %v630_v19 }
 0x208   :  { %v890_v21 = vpop.f32.mrf.mxu1 }
 0x209   :  { %v634_v22 = vmax.f32 %v631_v20, 0.0 }
 0x20b   :  { %v643_v23 = vmul.f32 %v634_v22, %v634_v22  ;;  %v635_v24 = vmul.f32 %v634_v22, %v369_v16 }
 0x20d   :  { %v644_v25 = vsel %vm208_vm8, %v643_v23, 0.0  ;;  %v636_v26 = vsel %vm208_vm8, %v635_v24, 0.0 }
 0x20e   :  { %645 = vadd.xlane.f32.xlu0 %v644_v25  ;;  %637 = vadd.xlane.f32.xlu1 %v636_v26 }
 0x27e   :  { %v642_v27 = vpop.xlane.xlu0 %641 }
 0x297   :  { %v646_v28 = vpop.xlane.xlu0 %645  ;;  %v638_v32 = vpop.xlane.xlu1 %637 }
 0x298   :  { %v647_v29 = vmul.f32 %v646_v28, %v642_v27 }
 0x29a   :  { %v648_v30 = vmax.f32 %v647_v29, 1e-16 }
 0x29c   :  { %902 = vrsqrt.f32 %v648_v30 }
 0x2a9   :  { %v903_v31 = vpop.eup %902 }
 0x2aa   :  { %v650_v33 = vmul.f32 %v903_v31, %v638_v32 }
 0x2ac   :  { %vm651_vm9 = vcmp.lt.f32.partialorder %v650_v33, 1e-06 }
 0x2ad   :  { %v652_v34 = vsel %vm651_vm9, 1e-06, %v650_v33 }
 0x2ae   :  { %653 = vst [vmem:[#allocation13] sm:$0xff] %v652_v34 }
 0x2af   :  { %1015 = shalt.err (!%p1012_p5)
}
 0x2b0   :  { %663 = dma.vmem_to_hbm [thread:$0]  %s661_s7, 128, %s1244_s8, [#allocation7]  }
 0x2b1   :  { %1032 = dma.done.wait [#allocation7], 128  }
 0x2b2   :  { %1033 = vsyncadd [#allocation7], 4294967168 }
 0x2b3   :  { %667 = vsyncpa [#allocation6], 1 }
 0x2b4   :  { %668 = vsyncpa [#allocation9], 1 }
 0x2b5   :  { %669 = vsyncpa [#allocation12], 1 }
 0x2b6   :  { %670 = vsyncpa [#allocation7], 1 }

</bundles_post_ra>
